<compile_context>
chip_gen: v5e
topology: v5e:2x2
jax: 0.10.0
libtpu: 0.0.40
codegen_flags: <defaults>
</compile_context>

<pallas_src>
import math

import jax
import jax.numpy as jnp
from jax.experimental import pallas as pl
from jax.experimental.pallas import tpu as pltpu


def _round_up(x: int, m: int) -> int:
    return (x + m - 1) // m * m


def _kv_fused_kernel(x_ref, wkv_ref, bkv_ref, kv_ref):
    # x_ref  : (TM, F)       input tile (pipelined along the M grid axis)
    # wkv_ref: (F, Kf+Vf)    fused weights (constant index_map -> resident)
    # bkv_ref: (1, Kf+Vf)    fused bias, f32
    # kv_ref : (TM, Kf+Vf)   fused output tile (lane-dense store)
    acc = jnp.dot(x_ref[...], wkv_ref[...], preferred_element_type=jnp.float32)
    acc = acc + bkv_ref[...]              # bias add kept in f32 (v5e VPU has no bf16)
    kv_ref[...] = acc.astype(kv_ref.dtype)


def kv_map(x, wk, bk, wv, bv, *, tile_m=256, compute_dtype=None):
    """Fused KV projection (CompositeKVmap forward semantics).

    x  : (*, S, F)
    wk : (F, Kf)    bk : (1, Kf)
    wv : (F, Vf)    bv : (1, Vf)
    compute_dtype : optional dtype (e.g. jnp.bfloat16) for the MXU inputs;
                    accumulation and bias add stay in f32.
    returns k: (*, S, Kf), v: (*, S, Vf)  in x.dtype
    """
    *lead, F = x.shape
    Kf = wk.shape[1]
    Vf = wv.shape[1]
    N = Kf + Vf
    M = math.prod(lead) if lead else 1

    out_dtype = x.dtype
    in_dtype = jnp.dtype(compute_dtype) if compute_dtype is not None else jnp.dtype(x.dtype)

    # Fuse weights / biases once outside the kernel (one MXU weight slab).
    wkv = jnp.concatenate([wk, wv], axis=1).astype(in_dtype)
    bkv = jnp.concatenate([bk.reshape(1, Kf), bv.reshape(1, Vf)], axis=1).astype(jnp.float32)

    x2 = x.reshape(M, F).astype(in_dtype)

    # M-tile: as large as requested (256/512/1024 are good sweeps; multiples of
    # 256 saturate the v6e/v7x MXU, multiples of 128 suffice on v5e), clamped
    # to the problem size and kept sublane-aligned for the compute dtype.
    sub = max(8, 32 // in_dtype.itemsize)          # 8 for f32, 16 for bf16
    tm = max(sub, min(int(tile_m), _round_up(M, sub)))
    tm = _round_up(tm, sub)

    # Ragged-tail handling: pad M to the tile (fast unmasked path), slice after.
    m_pad = _round_up(M, tm)
    if m_pad != M:
        x2 = jnp.pad(x2, ((0, m_pad - M), (0, 0)))
    grid = (m_pad // tm,)

    # Explicit VMEM budget (double-buffered x/out tiles + resident weights).
    # NOTE: weights keep the default pipelining (2 buffers) for robustness;
    # they are tiny relative to the budget here.  pl.Buffered(1) would halve
    # their footprint if weight residency ever became the VMEM limiter.
    in_bytes = in_dtype.itemsize
    out_bytes = jnp.dtype(out_dtype).itemsize
    vmem_need = (2 * tm * F * in_bytes          # x tiles
                 + 2 * F * N * in_bytes         # fused weights
                 + 2 * N * 4                    # fused bias
                 + 2 * tm * N * out_bytes)      # output tiles

    compiler_kwargs = dict(dimension_semantics=("parallel",))
    if vmem_need > 12 * 1024 * 1024:
        # Raise the scoped VMEM limit (16 MiB default on v5e, 32 MiB on
        # v6e/v7x) with headroom, staying well under v7x's 64 MiB physical.
        compiler_kwargs["vmem_limit_bytes"] = int(
            min(max(2 * vmem_need, 32 * 1024 * 1024), 60 * 1024 * 1024))

    cost = pl.CostEstimate(
        flops=2 * m_pad * F * N,
        transcendentals=0,
        bytes_accessed=(m_pad * F * in_bytes + F * N * in_bytes + N * 4
                        + m_pad * N * out_bytes),
    )

    # TODO(synk): for very large F the (tm, F) tile + weights may exceed VMEM
    # (notably v7x's 64 MiB); add an F grid axis with an f32 accumulator then.
    kv2 = pl.pallas_call(
        _kv_fused_kernel,
        out_shape=jax.ShapeDtypeStruct((m_pad, N), out_dtype),
        grid_spec=pltpu.PrefetchScalarGridSpec(
            num_scalar_prefetch=0,
            grid=grid,
            in_specs=[
                pl.BlockSpec((tm, F), lambda i: (i, 0)),   # x tile (pipelined)
                pl.BlockSpec((F, N), lambda i: (0, 0)),    # fused weights
                pl.BlockSpec((1, N), lambda i: (0, 0)),    # fused bias
            ],
            out_specs=pl.BlockSpec((tm, N), lambda i: (i, 0)),
        ),
        compiler_params=pltpu.CompilerParams(**compiler_kwargs),
        cost_estimate=cost,
    )(x2, wkv, bkv)

    k2 = kv2[:M, :Kf]
    v2 = kv2[:M, Kf:]
    return k2.reshape(*lead, Kf), v2.reshape(*lead, Vf)


if __name__ == "__main__":
    # Small shapes consistent with the KVmap interface: (*, S, F) -> (*, S, K), (*, S, V)
    B, S, F = 2, 8, 32
    K_FEATS, V_FEATS = 32, 32

    key = jax.random.PRNGKey(0)
    kx, kwk, kbk, kwv, kbv = jax.random.split(key, 5)

    x = jax.random.normal(kx, (B, S, F), dtype=jnp.float32)
    # nn.Linear-like parameters (y = x @ W^T + b), stored pre-transposed as (F, out).
    wk = jax.random.normal(kwk, (F, K_FEATS), dtype=jnp.float32) * 0.1
    bk = jax.random.normal(kbk, (1, K_FEATS), dtype=jnp.float32) * 0.1
    wv = jax.random.normal(kwv, (F, V_FEATS), dtype=jnp.float32) * 0.1
    bv = jax.random.normal(kbv, (1, V_FEATS), dtype=jnp.float32) * 0.1

    # Pure-JAX reference (CompositeKVmap forward semantics).
    k_ref = x @ wk + bk[0]
    v_ref = x @ wv + bv[0]

    # f32 path (tight tolerance).
    k_out, v_out = kv_map(x, wk, bk, wv, bv)
    jax.block_until_ready((k_out, v_out))
    assert k_out.shape == (B, S, K_FEATS)
    assert v_out.shape == (B, S, V_FEATS)
    assert jnp.allclose(k_out, k_ref, atol=1e-5, rtol=1e-5)
    assert jnp.allclose(v_out, v_ref, atol=1e-5, rtol=1e-5)

    # bf16 MXU path (v6e/v7x fast path), f32 accumulate; loose tolerance.
    k_bf, v_bf = kv_map(x.astype(jnp.bfloat16), wk, bk, wv, bv,
                        compute_dtype=jnp.bfloat16)
    jax.block_until_ready((k_bf, v_bf))
    assert k_bf.shape == (B, S, K_FEATS)
    assert v_bf.shape == (B, S, V_FEATS)
    assert jnp.allclose(k_bf.astype(jnp.float32), k_ref, atol=1e-1, rtol=5e-2)
    assert jnp.allclose(v_bf.astype(jnp.float32), v_ref, atol=1e-1, rtol=5e-2)

    print("KERNEL_OK")
</pallas_src>

<mosaic_0001>
module attributes {stable_mosaic.version = 11 : i64} {
  func.func @_kv_fused_kernel(%arg0: i32, %arg1: memref<16x32xf32, #tpu.memory_space<vmem>>, %arg2: memref<32x64xf32, #tpu.memory_space<vmem>>, %arg3: memref<1x64xf32, #tpu.memory_space<vmem>>, %arg4: memref<16x64xf32, #tpu.memory_space<vmem>>) attributes {dimension_semantics = [#tpu.dimension_semantics<parallel>], iteration_bounds = array<i64: 1>, scalar_prefetch = 0 : i64, scratch_operands = 0 : i64, tpu.core_type = #tpu.core_type<tc>, window_params = [{transform_indices = @transform_0, window_bounds = array<i64: 16, 32>}, {pipeline_mode = #tpu.pipeline_mode<synchronous>, transform_indices = @transform_1, window_bounds = array<i64: 32, 64>}, {pipeline_mode = #tpu.pipeline_mode<synchronous>, transform_indices = @transform_2, window_bounds = array<i64: 1, 64>}, {transform_indices = @transform_3, window_bounds = array<i64: 16, 64>}]} {
    %c0 = arith.constant 0 : index
    %c0_0 = arith.constant 0 : index
    %0 = vector.load %arg1[%c0, %c0_0] : memref<16x32xf32, #tpu.memory_space<vmem>>, vector<16x32xf32>
    %c0_1 = arith.constant 0 : index
    %c0_2 = arith.constant 0 : index
    %1 = vector.load %arg2[%c0_1, %c0_2] : memref<32x64xf32, #tpu.memory_space<vmem>>, vector<32x64xf32>
    %cst = arith.constant dense<0.000000e+00> : vector<16x64xf32>
    %2 = tpu.matmul %0, %1, %cst {dimension_numbers = #tpu.dot_dimension_numbers<[1], [0], [0], [1], [0, 0, 1, 1], [], []>} : vector<16x32xf32>, vector<32x64xf32>, vector<16x64xf32> -> vector<16x64xf32>
    %c0_3 = arith.constant 0 : index
    %c0_4 = arith.constant 0 : index
    %3 = vector.load %arg3[%c0_3, %c0_4] : memref<1x64xf32, #tpu.memory_space<vmem>>, vector<1x64xf32>
    %4 = vector.broadcast %3 : vector<1x64xf32> to vector<16x64xf32>
    %5 = arith.addf %2, %4 : vector<16x64xf32>
    %c0_5 = arith.constant 0 : index
    %c0_6 = arith.constant 0 : index
    %6 = vector.load %arg4[%c0_5, %c0_6] : memref<16x64xf32, #tpu.memory_space<vmem>>, vector<16x64xf32>
    tpu.vector_store %arg4[%c0_5, %c0_6], %5 {strides = array<i32>} : memref<16x64xf32, #tpu.memory_space<vmem>>, vector<16x64xf32>,
    return
  }
  func.func @transform_0(%arg0: i32) -> (i32, i32) {
    %c0_i32 = arith.constant 0 : i32
    %c0_i32_0 = arith.constant 0 : i32
    return %arg0, %c0_i32 : i32, i32
  }
  func.func @transform_1(%arg0: i32) -> (i32, i32) {
    %c0_i32 = arith.constant 0 : i32
    %c0_i32_0 = arith.constant 0 : i32
    %c0_i32_1 = arith.constant 0 : i32
    return %c0_i32, %c0_i32_0 : i32, i32
  }
  func.func @transform_2(%arg0: i32) -> (i32, i32) {
    %c0_i32 = arith.constant 0 : i32
    %c0_i32_0 = arith.constant 0 : i32
    %c0_i32_1 = arith.constant 0 : i32
    return %c0_i32, %c0_i32_0 : i32, i32
  }
  func.func @transform_3(%arg0: i32) -> (i32, i32) {
    %c0_i32 = arith.constant 0 : i32
    %c0_i32_0 = arith.constant 0 : i32
    return %arg0, %c0_i32 : i32, i32
  }
}

</mosaic_0001>

<bundles_post_ra>
// kernel: tpu_custom_call.1
= control target key start
LH: loop header
LB: loop body
LE: loop exit
PB: predicated region body
PF: predicated region fallthrough
CT: control target
= control target key end

     0   :  { %8 = vsyncpa [#allocation3], 0  ;;  %s246_s0 = inlined_call_operand.hbm [shape: f32[16,32], index: 0, kind: input, shape index: {}]   ;;  %s247_s1 = inlined_call_operand.hbm [shape: f32[32,64], index: 1, kind: input, shape index: {}]   ;;  %s248_s2 = inlined_call_operand.vmem [shape: f32[1,64], index: 2, kind: input, shape index: {}]   ;;  %s249_s3 = inlined_call_operand.hbm [shape: f32[16,64], index: 3, kind: output, shape index: {}]  }
   0x1   :  { %9 = vsyncpa [#allocation6], 0 }
   0x2   :  { %10 = vsyncpa [#allocation4], 0  ;;  %s15_s14 = sshll.u32 %s246_s0, 4  ;;  %s200_s15 = smov [#allocation2]   ;;  %s16_s14 = int_to_ptr.hbm [resolvable:$true] %s15_s14 }
   0x3   :  { %s17_s16 = sshll.u32 %s200_s15, 4  ;;  %s28_s19 = sshll.u32 %s247_s1, 4  ;;  %s18_s16 = int_to_ptr.vmem [resolvable:$true] %s17_s16  ;;  %s29_s19 = int_to_ptr.hbm [resolvable:$true] %s28_s19 }
   0x4   :  { %s201_s20 = smov 128   ;;  %s202_s21 = smov 8  }
   0x5   :  { %23 = dma.hbm_to_vmem [thread:$0]  %s16_s14, 256, %s18_s16, [#allocation3], %s201_s20, %s201_s20, %s202_s21  }
   0x6   :  { %s203_s22 = smov [#allocation5]  }
   0x7   :  { %s30_s23 = sshll.u32 %s203_s22, 4  ;;  %s31_s23 = int_to_ptr.vmem [resolvable:$true] %s30_s23 }
   0x8   :  { %36 = dma.hbm_to_vmem [thread:$0]  %s29_s19, 512, %s31_s23, [#allocation6], %s201_s20, %s201_s20, %s202_s21  }
   0x9   :  { %194 = dma.done.wait [#allocation3], 256  }
   0xa   :  { %195 = vsyncadd [#allocation3], 4294967040 }
   0xb   :  { %196 = dma.done.wait [#allocation6], 512  }
   0xc   :  { %197 = vsyncadd [#allocation6], 4294966784  ;;  %v52_v0 = vld [vmem:[#allocation5 + $0x18] sm:$0xff]  ;;  %v51_v1 = vld [vmem:[#allocation5 + $0x10] sm:$0xff]  ;;  %vm57_vm0 = vcmask 261120   ;;  %s204_s24 = smov [#allocation7]  }
   0xd   :  { %76 = vmatpush.msra.mxu0 %v52_v0  ;;  %112 = vmatpush.msra.mxu1 %v52_v0  ;;  %v50_v2 = vld [vmem:[#allocation5 + $0x8] sm:$0xff]  ;;  %v49_v3 = vld [vmem:[#allocation5] sm:$0xff]  ;;  %v47_v4 = vld [vmem:[#allocation2] sm:$0xff]  ;;  %s94_s25 = sshll.u32 %s204_s24, 4  ;;  %s96_s28 = sshll.u32 %s249_s3, 4  ;;  %vm87_vm1 = vcmask 523264   ;;  %s95_s25 = int_to_ptr.vmem [resolvable:$true] %s94_s25  ;;  %s97_s28 = int_to_ptr.hbm [resolvable:$true] %s96_s28 }
   0xe   :  { %v48_v5 = vld [vmem:[#allocation2 + $0x8] sm:$0xff]  ;;  %v121_v6 = vld [vmem:[%s248_s2] ss:$0 sm:$0xff] }
   0xf   :  { %77 = vmatpush.msra.mxu0 %v51_v1  ;;  %113 = vmatpush.msra.mxu1 %v51_v1 }
  0x11   :  { %78 = vmatpush.msra.mxu0 %v50_v2  ;;  %114 = vmatpush.msra.mxu1 %v50_v2 }
  0x13   :  { %79 = vmatpush.msra.mxu0 %v49_v3  ;;  %115 = vmatpush.msra.mxu1 %v49_v3 }
  0x14   :  { %110 = vmatmul.msk.f32.vlgmr.msra.gmra.mxu0 %vm57_vm0, %v47_v4  ;;  %111 = vmatmul.msk.f32.vlgmr.msra.gmra.mxu1 %vm57_vm0, %v48_v5 }
  0x91   :  { %v81_v7 = vpop.f32.mrf.mxu0  ;;  %v84_v8 = vpop.f32.mrf.mxu1 }
  0x92   :  { %v82_v9 = vadd.f32 %v121_v6, %v81_v7  ;;  %v85_v10 = vadd.f32 %v121_v6, %v84_v8 }
  0x94   :  { %88 = vst.msk [vmem:[#allocation7] sm:$0xff] %vm87_vm1, %v82_v9 }
  0x95   :  { %89 = vst.msk [vmem:[#allocation7 + $0x8] sm:$0xff] %vm87_vm1, %v85_v10 }
  0x96   :  { %102 = dma.vmem_to_hbm [thread:$0]  %s95_s25, 256, %s97_s28, [#allocation4], %s201_s20, %s201_s20, %s202_s21  }
  0x97   :  { %198 = dma.done.wait [#allocation4], 256  }
  0x98   :  { %199 = vsyncadd [#allocation4], 4294967040 }
  0x99   :  { %107 = vsyncpa [#allocation3], 1 }
  0x9a   :  { %108 = vsyncpa [#allocation6], 1 }
  0x9b   :  { %109 = vsyncpa [#allocation4], 1 }

</bundles_post_ra>
